<compile_context>
chip_gen: v6e
topology: v6e:2x2x1
jax: 0.10.0
libtpu: 0.0.40
codegen_flags: <defaults>
</compile_context>

<pallas_src>
import jax
import jax.numpy as jnp
from jax.experimental import pallas as pl
from jax.experimental.pallas import tpu as pltpu


def _round_up(x, m):
    return ((x + m - 1) // m) * m


def _ddpm_forward_kernel(s_sig_ref, s_noi_ref, x0_ref, eta_ref, out_ref):
    """One grid step = one (tile_n, tile_c) tile.

    s_sig_ref : VMEM float32[(tile_n, 1)]   -- sqrt(alpha_bar[t]) per row
    s_noi_ref : VMEM float32[(tile_n, 1)]   -- sqrt(1 - alpha_bar[t]) per row
    x0_ref    : VMEM dtype  [(tile_n, tile_c)]
    eta_ref   : VMEM dtype  [(tile_n, tile_c)]
    out_ref   : VMEM dtype  [(tile_n, tile_c)]
    """
    x0 = x0_ref[...].astype(jnp.float32)        # in-register upcast (no HBM cost)
    eta = eta_ref[...].astype(jnp.float32)
    out = s_sig_ref[...] * x0 + s_noi_ref[...] * eta    # row-broadcast on VPU
    out_ref[...] = out.astype(out_ref.dtype)


def make_ddpm_schedule(n_steps=200, min_beta=1e-4, max_beta=0.02):
    """Deterministic DDPM schedule, mirroring MyDDPM.__init__."""
    betas = jnp.linspace(min_beta, max_beta, n_steps, dtype=jnp.float32)
    alphas = 1.0 - betas
    alpha_bars = jnp.cumprod(alphas)             # == [prod(alphas[:i+1]) for i]
    return alpha_bars


def _vmem_capacity_bytes():
    """Per-TensorCore VMEM; conservative fallback (v7x = 64 MiB/TC)."""
    try:
        info = pltpu.get_tpu_info()
        for attr in ("vmem_capacity_bytes", "vmem_size_bytes", "vmem_bytes"):
            v = getattr(info, attr, None)
            if v:
                return int(v)
    except Exception:
        pass
    try:
        kind = jax.devices()[0].device_kind.lower()
        if ("v5" in kind) or ("v6" in kind):
            return 128 << 20
    except Exception:
        pass
    return 64 << 20


def _choose_tiling(n, chw, itemsize):
    """Pick (tile_n, tile_c, vmem_limit_bytes) for this generation.

    v5e/v6e (128 MiB VMEM): ~8 MiB tiles; v7x (64 MiB/TC): ~4 MiB tiles so
    3 streams x 2 buffers stays well under ~48 MiB.  Bias toward full-row
    blocks (one contiguous DMA per tile row); for sub-32-bit dtypes round
    tile_n to the native sublane packing (16 for bf16, 32 for 8-bit).
    """
    vmem_phys = _vmem_capacity_bytes()
    if vmem_phys >= (128 << 20):
        max_tile_bytes = 8 << 20
        vmem_cap = 96 << 20
    else:
        max_tile_bytes = 4 << 20
        vmem_cap = 48 << 20

    pack = max(1, 4 // itemsize)        # elements per 32-bit sublane slot
    sub_mult = 8 * pack                 # 8 (f32), 16 (bf16), 32 (int8/fp8)
    lane_mult = 128

    # Prefer the full row as the lane dimension (legal even if chw % 128 != 0
    # because it equals the full array dim); otherwise split into 128-aligned
    # chunks that fit the per-tile budget at the minimum row count.
    if chw * itemsize * sub_mult <= max_tile_bytes:
        tile_c = chw
    else:
        tile_c = (max_tile_bytes // (sub_mult * itemsize)) // lane_mult * lane_mult
        tile_c = max(lane_mult, min(tile_c, _round_up(chw, lane_mult)))

    tile_n_cap = _round_up(n, sub_mult)
    tile_n = (max_tile_bytes // (tile_c * itemsize)) // sub_mult * sub_mult
    tile_n = min(max(sub_mult, tile_n), tile_n_cap)

    # Megacore: make sure at least one parallel grid axis has >= 2 tiles so
    # both TensorCores (v7x) get work; shrink tile_n first, else split tile_c.
    if pl.cdiv(n, tile_n) * pl.cdiv(chw, tile_c) == 1:
        if n > sub_mult:
            tile_n = _round_up(-(-n // 2), sub_mult)
        elif chw > 2 * lane_mult:
            tile_c = _round_up(-(-chw // 2), lane_mult)

    # Explicit VMEM budget: 3 streams x 2 buffers x tile + scale buffers + slack.
    tile_bytes = tile_n * tile_c * itemsize
    scale_bytes = 4 * tile_n * 128 * 4          # 2 scales x 2 buffers, lane-padded
    vmem_limit = 6 * tile_bytes + scale_bytes + (8 << 20)
    vmem_limit = min(max(vmem_limit, 32 << 20), vmem_cap)
    return tile_n, tile_c, vmem_limit


def ddpm_forward(x0, t, eta, alpha_bars):
    """noisy = sqrt(abar[t]) * x0 + sqrt(1 - abar[t]) * eta   (per-sample)."""
    n, c, h, w = x0.shape
    chw = c * h * w
    out_dtype = x0.dtype
    itemsize = x0.dtype.itemsize

    # Per-sample scales precomputed once in the wrapper (N scalars, negligible).
    a_bar = alpha_bars[t.astype(jnp.int32)].astype(jnp.float32)
    s_sig = jnp.sqrt(a_bar).reshape(n, 1)
    s_noi = jnp.sqrt(1.0 - a_bar).reshape(n, 1)

    # Flatten per-sample; keep the caller's dtype (upcast happens in-register).
    x0_flat = x0.reshape(n, chw)
    eta_flat = eta.reshape(n, chw)

    tile_n, tile_c, vmem_limit = _choose_tiling(n, chw, itemsize)

    # No padding / slicing: exact out_shape, partial boundary blocks.
    grid = (pl.cdiv(n, tile_n), pl.cdiv(chw, tile_c))

    out_flat = pl.pallas_call(
        _ddpm_forward_kernel,
        out_shape=jax.ShapeDtypeStruct((n, chw), out_dtype),
        grid_spec=pltpu.PrefetchScalarGridSpec(
            num_scalar_prefetch=0,
            grid=grid,
            in_specs=[
                # Scale block index depends only on i; with j as the innermost
                # grid axis Pallas skips redundant scale DMAs across the row.
                pl.BlockSpec((tile_n, 1), lambda i, j: (i, 0)),        # s_sig
                pl.BlockSpec((tile_n, 1), lambda i, j: (i, 0)),        # s_noi
                pl.BlockSpec((tile_n, tile_c), lambda i, j: (i, j)),   # x0
                pl.BlockSpec((tile_n, tile_c), lambda i, j: (i, j)),   # eta
            ],
            out_specs=pl.BlockSpec((tile_n, tile_c), lambda i, j: (i, j)),
        ),
        compiler_params=pltpu.CompilerParams(
            dimension_semantics=("parallel", "parallel"),
            vmem_limit_bytes=int(vmem_limit)),
    )(s_sig, s_noi, x0_flat, eta_flat)

    return out_flat.reshape(n, c, h, w)


if __name__ == "__main__":
    # Small shapes consistent with the module's forward (NCHW inputs).
    N, C, H, W = 2, 4, 16, 16
    n_steps = 200

    key = jax.random.PRNGKey(0)
    k_x, k_eta, k_t = jax.random.split(key, 3)
    x0 = jax.random.normal(k_x, (N, C, H, W), dtype=jnp.float32)
    eta = jax.random.normal(k_eta, (N, C, H, W), dtype=jnp.float32)
    t = jax.random.randint(k_t, (N,), 0, n_steps, dtype=jnp.int32)

    alpha_bars = make_ddpm_schedule(n_steps=n_steps)

    noisy = ddpm_forward(x0, t, eta, alpha_bars)
    jax.block_until_ready(noisy)

    # Reference check (plain JAX) for the exact PyTorch semantics.
    a_bar = alpha_bars[t].reshape(N, 1, 1, 1)
    ref = jnp.sqrt(a_bar) * x0 + jnp.sqrt(1.0 - a_bar) * eta
    assert jnp.allclose(noisy, ref, atol=1e-6, rtol=1e-6)

    # TODO(synk): eta could optionally be generated in-kernel with
    # pltpu.prng_seed/prng_random_bits to save one full HBM read, but the
    # module's forward accepts a caller-supplied eta, which is what we match.
    # TODO(synk): MyDDPM.backward delegates to an external `network` (UNet)
    # not defined in this module, so it is not implemented here.
    print("KERNEL_OK")
</pallas_src>

<mosaic_0001>
module attributes {stable_mosaic.version = 11 : i64} {
  func.func @_ddpm_forward_kernel(%arg0: i32, %arg1: i32, %arg2: memref<8x1xf32, #tpu.memory_space<vmem>>, %arg3: memref<8x1xf32, #tpu.memory_space<vmem>>, %arg4: memref<8x512xf32, #tpu.memory_space<vmem>>, %arg5: memref<8x512xf32, #tpu.memory_space<vmem>>, %arg6: memref<8x512xf32, #tpu.memory_space<vmem>>) attributes {dimension_semantics = [#tpu.dimension_semantics<parallel>, #tpu.dimension_semantics<parallel>], iteration_bounds = array<i64: 1, 2>, scalar_prefetch = 0 : i64, scratch_operands = 0 : i64, tpu.core_type = #tpu.core_type<tc>, window_params = [{transform_indices = @transform_0, window_bounds = array<i64: 8, 1>}, {transform_indices = @transform_1, window_bounds = array<i64: 8, 1>}, {transform_indices = @transform_2, window_bounds = array<i64: 8, 512>}, {transform_indices = @transform_3, window_bounds = array<i64: 8, 512>}, {transform_indices = @transform_4, window_bounds = array<i64: 8, 512>}]} {
    %c0 = arith.constant 0 : index
    %c0_0 = arith.constant 0 : index
    %0 = vector.load %arg4[%c0, %c0_0] : memref<8x512xf32, #tpu.memory_space<vmem>>, vector<8x512xf32>
    %c0_1 = arith.constant 0 : index
    %c0_2 = arith.constant 0 : index
    %1 = vector.load %arg5[%c0_1, %c0_2] : memref<8x512xf32, #tpu.memory_space<vmem>>, vector<8x512xf32>
    %c0_3 = arith.constant 0 : index
    %c0_4 = arith.constant 0 : index
    %2 = vector.load %arg2[%c0_3, %c0_4] : memref<8x1xf32, #tpu.memory_space<vmem>>, vector<8x1xf32>
    %3 = vector.broadcast %2 : vector<8x1xf32> to vector<8x512xf32>
    %4 = arith.mulf %3, %0 : vector<8x512xf32>
    %c0_5 = arith.constant 0 : index
    %c0_6 = arith.constant 0 : index
    %5 = vector.load %arg3[%c0_5, %c0_6] : memref<8x1xf32, #tpu.memory_space<vmem>>, vector<8x1xf32>
    %6 = vector.broadcast %5 : vector<8x1xf32> to vector<8x512xf32>
    %7 = arith.mulf %6, %1 : vector<8x512xf32>
    %8 = arith.addf %4, %7 : vector<8x512xf32>
    %c0_7 = arith.constant 0 : index
    %c0_8 = arith.constant 0 : index
    %9 = vector.load %arg6[%c0_7, %c0_8] : memref<8x512xf32, #tpu.memory_space<vmem>>, vector<8x512xf32>
    tpu.vector_store %arg6[%c0_7, %c0_8], %8 {strides = array<i32>} : memref<8x512xf32, #tpu.memory_space<vmem>>, vector<8x512xf32>,
    return
  }
  func.func @transform_0(%arg0: i32, %arg1: i32) -> (i32, i32) {
    %c0_i32 = arith.constant 0 : i32
    %c0_i32_0 = arith.constant 0 : i32
    return %arg0, %c0_i32 : i32, i32
  }
  func.func @transform_1(%arg0: i32, %arg1: i32) -> (i32, i32) {
    %c0_i32 = arith.constant 0 : i32
    %c0_i32_0 = arith.constant 0 : i32
    return %arg0, %c0_i32 : i32, i32
  }
  func.func @transform_2(%arg0: i32, %arg1: i32) -> (i32, i32) {
    %c0_i32 = arith.constant 0 : i32
    return %arg0, %arg1 : i32, i32
  }
  func.func @transform_3(%arg0: i32, %arg1: i32) -> (i32, i32) {
    %c0_i32 = arith.constant 0 : i32
    return %arg0, %arg1 : i32, i32
  }
  func.func @transform_4(%arg0: i32, %arg1: i32) -> (i32, i32) {
    %c0_i32 = arith.constant 0 : i32
    return %arg0, %arg1 : i32, i32
  }
}

</mosaic_0001>

<bundles_post_ra>
// kernel: tpu_custom_call.1
= control target key start
LH: loop header
LB: loop body
LE: loop exit
PB: predicated region body
PF: predicated region fallthrough
CT: control target
= control target key end

     0   :  { %s1117_s0 = inlined_call_operand.vmem [shape: f32[2,1], index: 0, kind: input, shape index: {}]   ;;  %s1118_s1 = inlined_call_operand.vmem [shape: f32[2,1], index: 1, kind: input, shape index: {}]   ;;  %s1119_s2 = inlined_call_operand.hbm [shape: f32[2,1024], index: 2, kind: input, shape index: {}]   ;;  %s1120_s3 = inlined_call_operand.hbm [shape: f32[2,1024], index: 3, kind: input, shape index: {}]   ;;  %s1121_s4 = inlined_call_operand.hbm [shape: f32[2,1024], index: 4, kind: output, shape index: {}]  }
   0x1   :  { %1123 = sst [smem:[#allocation12_spill]] %s1119_s2 }
   0x2   :  { %9 = vsyncpa [#allocation3], 0 }
   0x3   :  { %11 = vsyncpa [#allocation3 + $0x1], 0 }
   0x4   :  { %12 = vsyncpa [#allocation6], 0 }
   0x5   :  { %14 = vsyncpa [#allocation6 + $0x1], 0 }
   0x6   :  { %15 = vsyncpa [#allocation4], 0 }
   0x7   :  { %17 = vsyncpa [#allocation4 + $0x1], 0  ;;  %s971_s15 = smov 0   ;;  %s973_s16 = smov 0  }
   0x8   :  { %s975_s17 = smov 0   ;;  %s977_s18 = smov 0  }
   0x9   :  { %s979_s19 = smov 0   ;;  %s981_s20 = smov 0  }
   0xa LB: > { %s702_s21 = sadd.s32 4294967295, %s930_s20   ;;  %s703_s22 = sadd.s32 4294967294, %s930_s20   ;;  %s930_s20 = sphi %s981_s20, %s23_s20   ;;  %s926_s19 = sphi %s979_s19, %s1135_s19   ;;  %s922_s18 = sphi %s977_s18, %s1134_s18   ;;  %s918_s17 = sphi %s975_s17, %s1133_s17   ;;  %s914_s16 = sphi %s973_s16, %s1132_s16   ;;  %s910_s15 = sphi %s971_s15, %s1131_s15  }
   0xb   : > { %s32_s23 = sadd.s32 1, %s926_s19  ;;  %s96_s24 = sadd.s32 1, %s918_s17 }
   0xc   : > { %p33_p0 = scmp.ge.s32.totalorder %s32_s23, 2  ;;  %p103_p1 = scmp.ne.s32.totalorder %s918_s17, %s914_s16 }
   0xd   : > { %p104_p2 = scmp.eq.s32.totalorder %s930_s20, 0  ;;  %p109_p3 = scmp.ne.s32.totalorder %s914_s16, %s910_s15 }
   0xe   : > { %s1137_s23 = smov (%p33_p0, %s32_s23), 0  ;;  %p110_p5 = scmp.eq.s32.totalorder %s702_s21, 0 }
   0xf   : > { %1124 = sst [smem:[#allocation11_spill]] %s1137_s23  ;;  %p1012_p4 = por %p104_p2, %p103_p1 }
  0x10   : > { %s92_s26 = ssub.s32 %s926_s19, %s1137_s23  ;;  %p163_p6 = scmp.eq.s32.totalorder %s702_s21, 1 }
  0x11   : > { %p94_p7 = scmp.eq.s32.totalorder %s92_s26, 0  ;;  %p1018_p8 = por %p110_p5, %p109_p3 }
  0x12   : > { %p1022_p9 = por %p163_p6, %p103_p1  ;;  %p169_p10 = scmp.eq.s32.totalorder %s703_s22, 1 }
  0x13   : > { %s1027_s29 = scalar_select %p94_p7, %s918_s17, %s96_s24  }
  0x14   : > { %p1029_p11 = por %p169_p10, %p109_p3  ;;  %p707_p12 = scmp.ge.s32.totalorder %s930_s20, 2 }
  0x16   : > { %211 = sbr.rel (%p707_p12) target bundleno = 67 (0x43), region = 24 }
  0x1b   : > { %214 = sbr.rel (!%p1012_p4) target bundleno = 47 (0x2f), region = 28  ;;  %s215_s5 = sand.u32 (%p1012_p4), 1, %s918_s17  }
  0x1c   : > { %s708_s6 = sshll.u32 (%p1012_p4), %s215_s5, 5  ;;  %s216_s7 = scalar_lea.sflag (%p1012_p4), [#allocation3], %s215_s5 }
  0x1d   : > { %s219_s8 = scalar_lea.vmem (%p1012_p4), [#allocation2], %s708_s6 }
  0x20   : > { %227 = vsyncadd %s216_s7, 384  ;;  %s723_s9 = sshll.u32 %s926_s19, 7  ;;  %s234_s10 = sshll.u32 %s219_s8, 4  ;;  %s235_s10 = int_to_ptr.vmem [resolvable:$true] %s234_s10 }
  0x21   : > { %s1129_s2 = sld [smem:[#allocation12_spill]]  ;;  %s816_s14 = scalar_lea.vmem %s235_s10, 128 }
  0x22   : > { %p817_p13 = scmp.ne.s32.totalorder %s235_s10, %s816_s14  ;;  %s932_s21 = smov [#allocation2]  }
  0x23   : > { %s818_s22 = sshll.u32 %s932_s21, 4  ;;  %s819_s22 = int_to_ptr.vmem [resolvable:$false] %s818_s22 }
  0x24   : > { %s820_s24 = scalar_lea.vmem %s819_s22, 1024  ;;  %p821_p0 = scmp.lt.s32.totalorder %s235_s10, %s819_s22 }
  0x25   : > { %p822_p1 = scmp.lt.s32.totalorder %s820_s24, %s816_s14 }
  0x27   : > { %s232_s13 = scalar_lea.hbm %s1129_s2, %s723_s9  ;;  %p823_p2 = por %p822_p1, %p821_p0 }
  0x29   : > { %p824_p3 = pnand %p823_p2, %p817_p13 }
  0x2b   : > { %827 = shalt.err (!%p824_p3)
}
  0x2c   : > { %s933_s26 = smov 256   ;;  %s934_s5 = smov 128  }
  0x2d   : > { %s935_s6 = smov 8  }
  0x2e   : > { %240 = dma.hbm_to_vmem [thread:$0]  %s232_s13, 128, %s235_s10, %s216_s7, %s933_s26, %s934_s5, %s935_s6  }
  0x2f PF: > { %243 = sbr.rel (!%p1012_p4) target bundleno = 67 (0x43), region = 32  ;;  %s244_s8 = sand.u32 (%p1012_p4), 1, %s918_s17  }
  0x30   : > { %s711_s9 = sshll.u32 (%p1012_p4), %s244_s8, 5  ;;  %s245_s11 = scalar_lea.sflag (%p1012_p4), [#allocation6], %s244_s8 }
  0x31   : > { %s248_s12 = scalar_lea.vmem (%p1012_p4), [#allocation5], %s711_s9 }
  0x34   : > { %256 = vsyncadd %s245_s11, 384  ;;  %s724_s21 = sshll.u32 %s926_s19, 7  ;;  %s263_s14 = sshll.u32 %s248_s12, 4  ;;  %s264_s14 = int_to_ptr.vmem [resolvable:$true] %s263_s14 }
  0x35   : > { %s261_s2 = scalar_lea.hbm %s1120_s3, %s724_s21  ;;  %s838_s23 = scalar_lea.vmem %s264_s14, 128 }
  0x36   : > { %p839_p5 = scmp.ne.s32.totalorder %s264_s14, %s838_s23  ;;  %s936_s7 = smov [#allocation5]  }
  0x37   : > { %s840_s10 = sshll.u32 %s936_s7, 4  ;;  %s841_s10 = int_to_ptr.vmem [resolvable:$false] %s840_s10 }
  0x38   : > { %s842_s25 = scalar_lea.vmem %s841_s10, 1024  ;;  %p843_p4 = scmp.lt.s32.totalorder %s264_s14, %s841_s10 }
  0x39   : > { %p844_p6 = scmp.lt.s32.totalorder %s842_s25, %s838_s23 }
  0x3b   : > { %p845_p7 = por %p844_p6, %p843_p4 }
  0x3d   : > { %p846_p10 = pnand %p845_p7, %p839_p5 }
  0x3f   : > { %849 = shalt.err (!%p846_p10)
}
  0x40   : > { %s937_s13 = smov 256   ;;  %s938_s26 = smov 128  }
  0x41   : > { %s939_s5 = smov 8  }
  0x42   : > { %269 = dma.hbm_to_vmem [thread:$0]  %s261_s2, 128, %s264_s14, %s245_s11, %s937_s13, %s938_s26, %s939_s5  }
  0x43 PF: > { %p714_p13 = scmp.ge.s32.totalorder %s930_s20, 1  ;;  %p271_p0 = scmp.lt.s32.totalorder %s930_s20, 3 }
  0x45   : > { %p272_p1 = pnand %p714_p13, %p271_p0 }
  0x46   : > { %s1053_s6 = sand.u32 (!%p272_p1), 1, %s914_s16  }
  0x47   : > { %275 = sbr.rel (%p272_p1) target bundleno = 245 (0xf5), region = 36  ;;  %s1056_s23 = sshll.u32 (!%p272_p1), %s1053_s6, 5 }
  0x48   : > { %s278_s8 = scalar_lea.sflag (!%p272_p1), [#allocation3], %s1053_s6  ;;  %s281_s9 = scalar_lea.vmem (!%p272_p1), [#allocation2], %s1056_s23 }
  0x4c   : > { %897 = dma.done.wait (%p1018_p8), %s278_s8, 512  }
  0x4d   : > { %899 = vsyncadd (%p1018_p8), %s278_s8, 4294966784  ;;  %s287_s2 = scalar_lea.sflag [#allocation6], %s1053_s6  ;;  %s290_s11 = scalar_lea.vmem [#allocation5], %s1056_s23 }
  0x4e   : > { %901 = dma.done.wait (%p1018_p8), %s287_s2, 512  }
  0x4f   : > { %903 = vsyncadd (%p1018_p8), %s287_s2, 4294966784  ;;  %v940_v0 = vmov 0   ;;  %v377_v1 = vld [vmem:[%s1117_s0] sm:$0xff]  ;;  %v941_v3 = vmov 1983009808   ;;  %v394_v5 = vlaneseq  ;;  %s333_s27 = scalar_lea.vmem [#allocation7], %s1056_s23 }
  0x50   : > { %793 = vset.pattern.permute.xlu0 %v940_v0  ;;  %v431_v2 = vld [vmem:[%s1118_s1] sm:$0xff]  ;;  %v392_v4 = vunpack.c.l.s4 %v941_v3  ;;  %v797_v11 = vld [vmem:[%s281_s9 + $0x10] ss:$8 sps:$4 sm:$0xff]   ;;  %v799_v12 = vld [vmem:[%s281_s9 + $0x14] ss:$8 sps:$4 sm:$0xff]   ;;  %s538_s24 = scalar_lea.sflag [#allocation4], %s1053_s6 }
  0x51   : > { %380 = vperm.xlu0 %793, %v377_v1   ;;  %v395_v7 = vshrl.u32 %v394_v5, 7  ;;  %v794_v8 = vld [vmem:[%s281_s9] ss:$8 sps:$4 sm:$0xff]   ;;  %v796_v9 = vld [vmem:[%s281_s9 + $0x4] ss:$8 sps:$4 sm:$0xff]  }
  0x52   : > { %v393_v6 = vunpack.c.0.s8 %v392_v4  ;;  %v800_v13 = vld [vmem:[%s290_s11] ss:$8 sps:$4 sm:$0xff]   ;;  %v802_v14 = vld [vmem:[%s290_s11 + $0x4] ss:$8 sps:$4 sm:$0xff]   ;;  %v803_v15 = vld [vmem:[%s290_s11 + $0x10] ss:$8 sps:$4 sm:$0xff]  }
  0x53   : > { %v805_v16 = vld [vmem:[%s290_s11 + $0x14] ss:$8 sps:$4 sm:$0xff]  }
  0x54   : > { %v396_v10 = vsub.s32 %v393_v6, %v395_v7 }
  0x55   : > { %434 = vperm.xlu0 %793, %v431_v2  }
  0x56   : > { %v397_v17 = vrot.slane %v794_v8, %v396_v10  ;;  %v404_v18 = vrot.slane %v796_v9, %v396_v10  ;;  %v411_v19 = vrot.slane %v797_v11, %v396_v10  ;;  %v418_v20 = vrot.slane %v799_v12, %v396_v10 }
  0x57   : > { %v451_v21 = vrot.slane %v800_v13, %v396_v10  ;;  %v458_v22 = vrot.slane %v802_v14, %v396_v10  ;;  %v465_v23 = vrot.slane %v803_v15, %v396_v10  ;;  %v472_v24 = vrot.slane %v805_v16, %v396_v10 }
  0x58   : > { %v419_v26 = vcombine.low %v397_v17, %v411_v19  ;;  %v420_v27 = vcombine.high %v397_v17, %v411_v19  ;;  %v421_v28 = vcombine.low %v404_v18, %v418_v20  ;;  %v422_v29 = vcombine.high %v404_v18, %v418_v20 }
  0x59   : > { %v473_v30 = vcombine.low %v451_v21, %v465_v23  ;;  %v474_v31 = vcombine.high %v451_v21, %v465_v23  ;;  %v475_v32 = vcombine.low %v458_v22, %v472_v24  ;;  %v476_v33 = vcombine.high %v458_v22, %v472_v24 }
  0xcc   : > { %v381_v25 = vpop.permute.xlu0 %380 }
  0xcd   : > { %v427_v34 = vmul.f32 %v419_v26, %v381_v25  ;;  %v428_v35 = vmul.f32 %v420_v27, %v381_v25  ;;  %v429_v36 = vmul.f32 %v421_v28, %v381_v25  ;;  %v430_v37 = vmul.f32 %v422_v29, %v381_v25 }
  0xd0   : > { %v435_v38 = vpop.permute.xlu0 %434 }
  0xd1   : > { %v481_v39 = vmul.f32 %v473_v30, %v435_v38  ;;  %v482_v40 = vmul.f32 %v474_v31, %v435_v38  ;;  %v483_v41 = vmul.f32 %v475_v32, %v435_v38  ;;  %v484_v42 = vmul.f32 %v476_v33, %v435_v38 }
  0xd3   : > { %v485_v43 = vadd.f32 %v481_v39, %v427_v34  ;;  %v486_v44 = vadd.f32 %v482_v40, %v428_v35  ;;  %v487_v45 = vadd.f32 %v483_v41, %v429_v36  ;;  %v488_v46 = vadd.f32 %v484_v42, %v430_v37 }
  0xd5   : > { %v493_v47 = vcombine.low %v485_v43, %v486_v44  ;;  %v494_v48 = vcombine.high %v485_v43, %v486_v44  ;;  %v495_v49 = vcombine.low %v487_v45, %v488_v46  ;;  %v496_v50 = vcombine.high %v487_v45, %v488_v46 }
  0xd7   : > { %v503_v51 = vrot.slane %v493_v47, %v396_v10  ;;  %v510_v52 = vrot.slane %v494_v48, %v396_v10  ;;  %v517_v53 = vrot.slane %v495_v49, %v396_v10  ;;  %v524_v54 = vrot.slane %v496_v50, %v396_v10 }
  0xd8   : > { %544 = sbr.rel (!%p1022_p9) target bundleno = 245 (0xf5), region = 48 }
  0xd9   : > { %v525_v55 = vcombine.low %v503_v51, %v517_v53  ;;  %v526_v56 = vcombine.high %v503_v51, %v517_v53  ;;  %v527_v57 = vcombine.low %v510_v52, %v524_v54  ;;  %v528_v58 = vcombine.high %v510_v52, %v524_v54 }
  0xdb   : > { %533 = vst [vmem:[%s333_s27] sm:$0xff] %v525_v55  ;;  %534 = vst [vmem:[%s333_s27 + $0x8] sm:$0xff] %v526_v56 }
  0xdc   : > { %535 = vst [vmem:[%s333_s27 + $0x10] sm:$0xff] %v527_v57  ;;  %536 = vst [vmem:[%s333_s27 + $0x18] sm:$0xff] %v528_v58 }
  0xdd   : > { %552 = vsyncadd %s538_s24, 384  ;;  %s725_s7 = sshll.u32 %s922_s18, 7  ;;  %s559_s10 = sshll.u32 %s333_s27, 4  ;;  %s560_s10 = int_to_ptr.vmem [resolvable:$true] %s559_s10 }
  0xde   : > { %s557_s26 = scalar_lea.hbm %s1121_s4, %s725_s7  ;;  %s850_s5 = scalar_lea.vmem %s560_s10, 128 }
  0xdf   : > { %p851_p8 = scmp.ne.s32.totalorder %s560_s10, %s850_s5  ;;  %s942_s23 = smov [#allocation7]  }
  0xe0   : > { %s852_s8 = sshll.u32 %s942_s23, 4  ;;  %s853_s8 = int_to_ptr.vmem [resolvable:$false] %s852_s8 }
  0xe1   : > { %s854_s9 = scalar_lea.vmem %s853_s8, 1024  ;;  %p855_p2 = scmp.lt.s32.totalorder %s560_s10, %s853_s8 }
  0xe2   : > { %p856_p3 = scmp.lt.s32.totalorder %s854_s9, %s850_s5 }
  0xe4   : > { %p857_p9 = por %p856_p3, %p855_p2 }
  0xe6   : > { %p858_p5 = pnand %p857_p9, %p851_p8 }
  0xe8   : > { %861 = shalt.err (!%p858_p5)
}
  0xe9   : > { %s862_s28 = scalar_lea.hbm %s557_s26, 128  ;;  %s864_s11 = scalar_lea.hbm %s1121_s4, 256 }
  0xea   : > { %p863_p4 = scmp.ne.s32.totalorder %s557_s26, %s862_s28  ;;  %p865_p6 = scmp.lt.s32.totalorder %s557_s26, %s1121_s4 }
  0xeb   : > { %p866_p7 = scmp.lt.s32.totalorder %s864_s11, %s862_s28 }
  0xed   : > { %p867_p10 = por %p866_p7, %p865_p6 }
  0xef   : > { %p868_p13 = pnand %p867_p10, %p863_p4 }
  0xf1   : > { %871 = shalt.err (!%p868_p13)
}
  0xf2   : > { %s943_s14 = smov 128   ;;  %s944_s22 = smov 256  }
  0xf3   : > { %s945_s27 = smov 8  }
  0xf4   : > { %565 = dma.vmem_to_hbm [thread:$0]  %s560_s10, 128, %s557_s26, %s538_s24, %s943_s14, %s944_s22, %s945_s27  }
  0xf5 PF: > { %s574_s7 = sand.u32 1, %s910_s15   ;;  %p730_p0 = pnand %p707_p12, %p1029_p11 }
  0xf6   : > { %s575_s25 = scalar_lea.sflag [#allocation4], %s574_s7 }
  0xf7   : > { %p731_p1 = pneg %p730_p0 }
  0xf9   : > { %905 = dma.done.wait (%p731_p1), %s575_s25, 512  }
  0xfa   : > { %907 = vsyncadd (%p731_p1), %s575_s25, 4294966784  ;;  %s23_s20 = sadd.s32 1, %s930_s20   ;;  %s1130_s6 = sld [smem:[#allocation11_spill]] }
  0xfb   : > { %p20_p8 = scmp.ge.s32.totalorder %s23_s20, 4   ;;  %s1131_s15 = smov %s914_s16 }
  0xfc   : > { %s1132_s16 = smov %s918_s17  ;;  %s1133_s17 = smov %s1027_s29 }
  0xfd   : > { %s1134_s18 = smov %s926_s19  ;;  %22 = sbr.rel (!%p20_p8) target bundleno = 10 (0xa), region = 100 }
 0x100   : > { %s1135_s19 = smov %s1130_s6 }
 0x102   :  { %580 = vsyncpa [#allocation3], 1 }
 0x103   :  { %582 = vsyncpa [#allocation3 + $0x1], 1 }
 0x104   :  { %583 = vsyncpa [#allocation6], 1 }
 0x105   :  { %585 = vsyncpa [#allocation6 + $0x1], 1 }
 0x106   :  { %586 = vsyncpa [#allocation4], 1 }
 0x107   :  { %588 = vsyncpa [#allocation4 + $0x1], 1 }

</bundles_post_ra>
